<compile_context>
chip_gen: v7x
topology: tpu7x:2x2x1
jax: 0.10.0
libtpu: 0.0.40
codegen_flags: <defaults>
</compile_context>

<pallas_src>
import jax
import jax.numpy as jnp
from jax.experimental import pallas as pl
from jax.experimental.pallas import tpu as pltpu


def _linear_mean_kernel(x_ref, w_ref, b_ref, o_ref):
    # x_ref: (B, IN)  f32 VMEM
    # w_ref: (OUT, IN) f32 VMEM   (PyTorch layout, no transpose needed)
    # b_ref: (OUT,)   f32 SMEM
    # o_ref: (1, 1)   f32 SMEM
    B, IN = x_ref.shape
    OUT = w_ref.shape[0]

    x = x_ref[...]                                  # (B, IN)
    w = w_ref[...]                                  # (OUT, IN)

    # Column sum of W over the OUT axis -> (1, IN); sublane reduction (XLU).
    cw = jnp.sum(w, axis=0, keepdims=True)

    # sum_{r,o} (x @ W^T)[r, o] == sum_{r,i} x[r,i] * cw[i]; VPU mul + reduce.
    total = jnp.sum(x * cw)

    # mean(bias): OUT is tiny & static -> unrolled scalar adds from SMEM.
    b_sum = b_ref[0]
    for o in range(1, OUT):
        b_sum = b_sum + b_ref[o]

    o_ref[0, 0] = total / jnp.float32(B * OUT) + b_sum / jnp.float32(OUT)


def linear_mean(x, weight, bias):
    """x: (B, IN) f32; weight: (OUT, IN) f32 (PyTorch layout); bias: (OUT,) f32.
    Returns scalar f32 == mean(x @ weight.T + bias)."""
    out = pl.pallas_call(
        _linear_mean_kernel,
        out_shape=jax.ShapeDtypeStruct((1, 1), jnp.float32),
        in_specs=[
            pl.BlockSpec(memory_space=pltpu.VMEM),   # x, whole array in VMEM
            pl.BlockSpec(memory_space=pltpu.VMEM),   # weight, whole array in VMEM
            pl.BlockSpec(memory_space=pltpu.SMEM),   # bias scalars in SMEM
        ],
        out_specs=pl.BlockSpec(memory_space=pltpu.SMEM),
    )(x, weight, bias)
    return out[0, 0]


if __name__ == "__main__":
    key = jax.random.PRNGKey(0)
    kx, kw, kb = jax.random.split(key, 3)

    B, IN, OUT = 8, 2, 2  # nn.Linear(2, 2); small batch of inputs
    x = jax.random.normal(kx, (B, IN), dtype=jnp.float32)
    # PyTorch Linear layout: weight (OUT, IN), bias (OUT,)
    weight = jax.random.normal(kw, (OUT, IN), dtype=jnp.float32) * 0.5
    bias = jax.random.normal(kb, (OUT,), dtype=jnp.float32) * 0.1

    result = linear_mean(x, weight, bias)
    jax.block_until_ready(result)

    # Reference check in plain JAX
    ref = jnp.mean(x @ weight.T + bias)
    assert jnp.allclose(result, ref, atol=1e-5, rtol=1e-5), (result, ref)

    print("KERNEL_OK")
</pallas_src>

<mosaic_0001>
module attributes {stable_mosaic.version = 11 : i64} {
  func.func @_linear_mean_kernel(%arg0: memref<8x2xf32, #tpu.memory_space<vmem>>, %arg1: memref<2x2xf32, #tpu.memory_space<vmem>>, %arg2: memref<2xf32, #tpu.memory_space<smem>>, %arg3: memref<1x1xf32, #tpu.memory_space<smem>>) attributes {dimension_semantics = [], scalar_prefetch = 0 : i64, scratch_operands = 0 : i64, tpu.core_type = #tpu.core_type<tc>} {
    %c0 = arith.constant 0 : index
    %c0_0 = arith.constant 0 : index
    %0 = vector.load %arg0[%c0, %c0_0] : memref<8x2xf32, #tpu.memory_space<vmem>>, vector<8x2xf32>
    %c0_1 = arith.constant 0 : index
    %c0_2 = arith.constant 0 : index
    %1 = vector.load %arg1[%c0_1, %c0_2] : memref<2x2xf32, #tpu.memory_space<vmem>>, vector<2x2xf32>
    %cst = arith.constant dense<0.000000e+00> : vector<2xf32>
    %2 = vector.multi_reduction <add>, %1, %cst [0] : vector<2x2xf32> to vector<2xf32>
    %3 = vector.shape_cast %2 : vector<2xf32> to vector<1x2xf32>
    %4 = vector.broadcast %3 : vector<1x2xf32> to vector<8x2xf32>
    %5 = arith.mulf %0, %4 : vector<8x2xf32>
    %6 = vector.shape_cast %5 : vector<8x2xf32> to vector<1x8x2xf32>
    %cst_3 = arith.constant dense<0.000000e+00> : vector<1xf32>
    %7 = vector.multi_reduction <add>, %6, %cst_3 [1, 2] : vector<1x8x2xf32> to vector<1xf32>
    %8 = vector.shape_cast %7 : vector<1xf32> to vector<1x1x1xf32>
    %9 = vector.extract %8[0, 0, 0] : f32 from vector<1x1x1xf32>
    %c0_4 = arith.constant 0 : index
    %10 = memref.load %arg2[%c0_4] : memref<2xf32, #tpu.memory_space<smem>>
    %c1 = arith.constant 1 : index
    %11 = memref.load %arg2[%c1] : memref<2xf32, #tpu.memory_space<smem>>
    %12 = arith.addf %10, %11 : f32
    %cst_5 = arith.constant 1.600000e+01 : f32
    %13 = arith.divf %9, %cst_5 : f32
    %cst_6 = arith.constant 2.000000e+00 : f32
    %14 = arith.divf %12, %cst_6 : f32
    %15 = arith.addf %13, %14 : f32
    %c0_7 = arith.constant 0 : index
    %c0_8 = arith.constant 0 : index
    %16 = memref.load %arg3[%c0_7, %c0_8] : memref<1x1xf32, #tpu.memory_space<smem>>
    memref.store %15, %arg3[%c0_7, %c0_8] : memref<1x1xf32, #tpu.memory_space<smem>>
    return
  }
}

</mosaic_0001>

<bundles_post_ra>
// kernel: tpu_custom_call.1
= control target key start
LH: loop header
LB: loop body
LE: loop exit
PB: predicated region body
PF: predicated region fallthrough
CT: control target
= control target key end

     0   :  { %8 = vsyncpa [#allocation4], 0  ;;  %s150_s0 = inlined_call_operand.vmem [shape: f32[8,2], index: 0, kind: input, shape index: {}]   ;;  %s151_s1 = inlined_call_operand.vmem [shape: f32[2,2], index: 1, kind: input, shape index: {}]   ;;  %s152_s2 = inlined_call_operand.vmem [shape: f32[2], index: 2, kind: input, shape index: {}]   ;;  %s153_s3 = inlined_call_operand.hbm [shape: f32[1,1], index: 3, kind: output, shape index: {}]  }
   0x1   :  { %9 = vsyncpa [#allocation3], 0  ;;  %s20_s14 = sshll.u32 %s152_s2, 4  ;;  %s21_s14 = int_to_ptr.vmem [resolvable:$true] %s20_s14 }
   0x2   :  { %s81_s15 = scalar_lea.vmem %s21_s14, 16  ;;  %p86_p1 = scmp.lt.s32.totalorder %s21_s14, %s21_s14 }
   0x3   :  { %p82_p0 = scmp.ne.s32.totalorder %s21_s14, %s81_s15  ;;  %p87_p2 = scmp.lt.s32.totalorder %s81_s15, %s81_s15 }
   0x5   :  { %p88_p3 = por %p87_p2, %p86_p1 }
   0x7   :  { %p89_p4 = pnand %p88_p3, %p82_p0 }
   0x9   :  { %92 = shalt.err (!%p89_p4)
}
   0xa   :  { %s107_s16 = smov [#allocation2]  }
   0xb   :  { %23 = dma.vmem_to_smem %s21_s14, 16, %s107_s16, [#allocation4]  }
   0xc   :  { %103 = dma.done.wait [#allocation4], 16  }
   0xd   :  { %104 = vsyncadd [#allocation4], 4294967280 }
   0xe   :  { %27 = sfence }
   0xf   :  { %v29_v0 = vld [vmem:[%s151_s1] sm:$0x3]  ;;  %vm30_vm0 = vcmask 9216   ;;  %vm39_vm1 = vcmask 15360   ;;  %s50_s1 = sld [smem:[#allocation2]]  ;;  %s76_s20 = sld [smem:[#allocation2 + $0x1]] }
  0x10   :  { %v31_v1 = vsel %vm30_vm0, %v29_v0, 0.0  ;;  %v28_v7 = vld [vmem:[%s150_s0] sm:$0xff]  ;;  %s93_s27 = scalar_lea.hbm %s153_s3, 16 }
  0x11   :  { %v32_v2 = vrot.slane %v31_v1, 4  ;;  %p94_p5 = scmp.ne.s32.totalorder %s153_s3, %s93_s27  ;;  %p97_p6 = scmp.lt.u32.totalorder %s93_s27, %s153_s3 }
  0x13   :  { %v33_v3 = vadd.f32 %v32_v2, %v31_v1  ;;  %p99_p7 = pnand %p97_p6, %p94_p5 }
  0x15   :  { %v34_v4 = vrot.slane %v33_v3, 2  ;;  %s52_s21 = sadd.f32 %s76_s20, %s50_s1 }
  0x17   :  { %v35_v5 = vadd.f32 %v34_v4, %v33_v3  ;;  %s58_s22 = smul.f32 0.5, %s52_s21 }
  0x19   :  { %v36_v6 = vrot.slane %v35_v5, 1 }
  0x1b   :  { %v37_v8 = vadd.f32 %v36_v6, %v35_v5 }
  0x1d   :  { %v38_v9 = vmul.f32 %v37_v8, %v28_v7 }
  0x1f   :  { %v40_v10 = vsel %vm39_vm1, %v38_v9, 0.0 }
  0x20   :  { %41 = vadd.xlane.f32.xlu0 %v40_v10 }
  0xad   :  { %v42_v11 = vpop.xlane.xlu0 %41 }
  0xae   :  { %v43_v12 = vrot.slane %v42_v11, 4 }
  0xb0   :  { %v44_v13 = vadd.f32 %v43_v12, %v42_v11 }
  0xb2   :  { %v45_v14 = vrot.slane %v44_v13, 2 }
  0xb4   :  { %v46_v15 = vadd.f32 %v45_v14, %v44_v13 }
  0xb6   :  { %v47_v16 = vrot.slane %v46_v15, 1 }
  0xb8   :  { %v48_v17 = vadd.f32 %v47_v16, %v46_v15 }
  0xba   :  { %77 = vpush %v48_v17 }
  0xeb   :  { %s78_s23 = spop %77 }
  0xec   :  { %s55_s24 = smul.f32 0.0625, %s78_s23 }
  0xee   :  { %s59_s0 = sadd.f32 %s58_s22, %s55_s24 }
  0xf0   :  { %61 = sst [smem:[#allocation5]] %s59_s0 }
  0xf1   :  { %102 = shalt.err (!%p99_p7)
}
  0xf2   :  { %s108_s5 = smov [#allocation5]  }
  0xf3   :  { %69 = dma.smem_to_hbm %s108_s5, 16, %s153_s3, [#allocation3]  }
  0xf4   :  { %105 = dma.done.wait [#allocation3], 16  }
  0xf5   :  { %106 = vsyncadd [#allocation3], 4294967280 }
  0xf6   :  { %73 = sfence }
  0xf7   :  { %74 = vsyncpa [#allocation3], 1 }
  0xf8   :  { %75 = vsyncpa [#allocation4], 1 }

</bundles_post_ra>
